<compile_context>
chip_gen: v5e
topology: v5e:2x2
jax: 0.10.0
libtpu: 0.0.40
codegen_flags: <defaults>
</compile_context>

<pallas_src>
import functools

import jax
import jax.numpy as jnp
from jax import lax
from jax.experimental import pallas as pl
from jax.experimental.pallas import tpu as pltpu


_VMEM_TARGET = 40 * 1024 * 1024      # resident-bytes target (fits v7x 64 MiB/TC)


def _ceil_div(a, b):
    return -(-a // b)


def _round_up(a, b):
    return _ceil_div(a, b) * b


def _align_feature(d):
    """Lane-dense padded feature dim.

    128-aligned always; bumped to 256 (full v6e/v7x 256x256 MXU tile) when that
    costs <= 25% extra padded width.  Typical model dims (512/1024/2048/4096)
    are already 256-aligned, so this only changes odd sizes.
    """
    d128 = _round_up(d, 128)
    d256 = _round_up(d, 256)
    return d256 if 4 * d256 <= 5 * d128 else d128


def _single_buffer_spec(shape, index_map):
    """BlockSpec for a grid-invariant operand: one VMEM buffer is enough."""
    if hasattr(pl, "Buffered"):
        try:
            return pl.BlockSpec(shape, index_map, pipeline_mode=pl.Buffered(1))
        except TypeError:
            pass
    return pl.BlockSpec(shape, index_map)


def _vmem_estimate(tm, dp, th, single_buffer_weights):
    """Rough resident-VMEM bytes: weight blocks, I/O tiles, in-kernel temps."""
    wbuf = 1 if single_buffer_weights else 2
    weights = wbuf * (2 * (2 * dp * th) + 4 * th)     # w1 + w2 bf16, b1 f32
    consts = 3 * 4 * dp                               # b2, gamma, beta f32 (1 buf)
    x_io = 2 * 4 * tm * dp                            # x f32, double-buffered
    o_io = 2 * 4 * tm * dp                            # out f32, double-buffered
    acc = 4 * tm * dp                                 # f32 accumulator scratch
    interm = 6 * tm * th + 4 * 4 * tm * dp            # h (f32 + bf16), LN temps
    return weights + consts + x_io + o_io + acc + interm


def ffn_kernel(x_ref, w1_ref, b1_ref, w2_ref, b2_ref, g_ref, beta_ref,
               o_ref, acc_ref, *, d_real):
    """One (token tile, hidden chunk) grid step.

    fc1 chunk -> relu -> partial fc2 accumulated into acc_ref (f32); on the
    last hidden chunk: bias + residual + LayerNorm -> o_ref.

    Feature dims are zero-padded to lane-dense widths.  Because x / weights /
    biases / gamma / beta are zero in the padded lanes, every intermediate's
    padded lanes are exactly zero; only LayerNorm's mean/var need the real
    dim_model (`d_real`) as normalizer plus a lane mask on the centered values.
    """
    k = pl.program_id(1)

    @pl.when(k == 0)
    def _():
        acc_ref[...] = jnp.zeros_like(acc_ref)

    # --- bf16 MXU path, f32 accumulation -----------------------------------
    xb = x_ref[...].astype(jnp.bfloat16)                          # (tm, Dp)
    h = jnp.dot(xb, w1_ref[...], preferred_element_type=jnp.float32)
    h = jnp.maximum(h + b1_ref[...], 0.0)                         # (tm, th) f32
    acc_ref[...] += jnp.dot(h.astype(jnp.bfloat16), w2_ref[...],
                            preferred_element_type=jnp.float32)   # (tm, Dp) f32

    # --- finalize: bias + residual + LayerNorm ------------------------------
    @pl.when(k == pl.num_programs(1) - 1)
    def _():
        x = x_ref[...].astype(jnp.float32)
        y = acc_ref[...] + b2_ref[...] + x        # dropout(p=0.0) == identity
        inv_d = jnp.float32(1.0 / d_real)
        mean = jnp.sum(y, axis=-1, keepdims=True) * inv_d
        centered = y - mean
        if d_real != y.shape[-1]:
            # Padded lanes of y are 0; (y - mean) would be -mean there. Mask
            # them so the two-pass variance is exact over the real lanes.
            lane = lax.broadcasted_iota(jnp.int32, y.shape, 1)
            centered = jnp.where(lane < d_real, centered, 0.0)
        var = jnp.sum(centered * centered, axis=-1, keepdims=True) * inv_d
        normed = centered * lax.rsqrt(var + 1e-5)   # rsqrt -> EUP (free slot)
        o_ref[...] = (normed * g_ref[...] + beta_ref[...]).astype(o_ref.dtype)


def position_wise_feed_forward(x, w1, b1, w2, b2, gamma, beta, *, tm=512):
    """x: (batch, seq, dim_model) float32. Returns same shape/dtype."""
    B, S, D = x.shape
    H = w1.shape[1]
    N = B * S

    # ---- lane-dense padded feature dims ------------------------------------
    Dp = _align_feature(D)
    Hp = _align_feature(H)

    # ---- token tile: even tiles, >= 2 grid steps (v7x megacore) -------------
    tm_cap = tm
    if Hp >= 4096:
        tm_cap = min(tm_cap, 256)      # keeps (tm, Hp) f32 intermediate sane
    if Dp >= 4096:
        tm_cap = min(tm_cap, 128)
    n_tiles = max(_ceil_div(N, tm_cap), 2 if N > 8 else 1)
    tm_eff = _round_up(_ceil_div(N, n_tiles), 8)

    # ---- hidden chunk: shrink until weights + intermediates fit VMEM --------
    th = Hp
    while th > 128 and _vmem_estimate(tm_eff, Dp, th, th == Hp) > _VMEM_TARGET:
        th = _round_up(_ceil_div(th, 2), 128)
    n_h = _ceil_div(Hp, th)
    Hp = n_h * th                      # pad hidden to whole chunks (zeros: exact)

    n_tiles = _ceil_div(N, tm_eff)
    Np = n_tiles * tm_eff

    # ---- pad (skip when already aligned) and cast weights to bf16 -----------
    x2d = x.reshape(N, D)
    if (Np, Dp) != (N, D):
        x2d = jnp.pad(x2d, ((0, Np - N), (0, Dp - D)))

    w1p = w1 if (Dp, Hp) == (D, H) else jnp.pad(w1, ((0, Dp - D), (0, Hp - H)))
    w2p = w2 if (Hp, Dp) == (H, D) else jnp.pad(w2, ((0, Hp - H), (0, Dp - D)))
    w1p = w1p.astype(jnp.bfloat16)
    w2p = w2p.astype(jnp.bfloat16)

    b1p = b1.reshape(1, H)
    if Hp != H:
        b1p = jnp.pad(b1p, ((0, 0), (0, Hp - H)))
    b2p = b2.reshape(1, D)
    gp = gamma.reshape(1, D)
    betap = beta.reshape(1, D)
    if Dp != D:
        pad = ((0, 0), (0, Dp - D))
        b2p, gp, betap = jnp.pad(b2p, pad), jnp.pad(gp, pad), jnp.pad(betap, pad)

    # ---- VMEM limit: honest estimate + headroom, capped for v7x -------------
    need = _vmem_estimate(tm_eff, Dp, th, n_h == 1)
    vmem_limit = int(min(56 << 20, max(32 << 20, need + (8 << 20))))

    # ---- block specs ---------------------------------------------------------
    if n_h == 1:
        # Fully resident weights: single-buffered, fetched once.
        w1_spec = _single_buffer_spec((Dp, th), lambda i, k: (0, 0))
        b1_spec = _single_buffer_spec((1, th), lambda i, k: (0, 0))
        w2_spec = _single_buffer_spec((th, Dp), lambda i, k: (0, 0))
    else:
        # Streamed over the hidden axis: keep default double buffering so the
        # next chunk's DMA overlaps the current chunk's matmuls.
        w1_spec = pl.BlockSpec((Dp, th), lambda i, k: (0, k))
        b1_spec = pl.BlockSpec((1, th), lambda i, k: (0, k))
        w2_spec = pl.BlockSpec((th, Dp), lambda i, k: (k, 0))

    out2d = pl.pallas_call(
        functools.partial(ffn_kernel, d_real=D),
        out_shape=jax.ShapeDtypeStruct((Np, Dp), x.dtype),
        grid_spec=pltpu.PrefetchScalarGridSpec(
            num_scalar_prefetch=0,
            grid=(n_tiles, n_h),
            in_specs=[
                pl.BlockSpec((tm_eff, Dp), lambda i, k: (i, 0)),      # x tokens
                w1_spec,                                              # w1 (bf16)
                b1_spec,                                              # b1
                w2_spec,                                              # w2 (bf16)
                _single_buffer_spec((1, Dp), lambda i, k: (0, 0)),    # b2
                _single_buffer_spec((1, Dp), lambda i, k: (0, 0)),    # gamma
                _single_buffer_spec((1, Dp), lambda i, k: (0, 0)),    # beta
            ],
            out_specs=pl.BlockSpec((tm_eff, Dp), lambda i, k: (i, 0)),
            scratch_shapes=[pltpu.VMEM((tm_eff, Dp), jnp.float32)],
        ),
        compiler_params=pltpu.CompilerParams(
            dimension_semantics=("parallel", "arbitrary"),
            vmem_limit_bytes=vmem_limit),
    )(x2d, w1p, b1p, w2p, b2p, gp, betap)

    if (Np, Dp) != (N, D):
        out2d = out2d[:N, :D]
    return out2d.reshape(B, S, D)


def reference_ffn(x, w1, b1, w2, b2, gamma, beta):
    """Pure-JAX f32 reference mirroring the PyTorch module."""
    h = jnp.maximum(jnp.einsum("bsd,dh->bsh", x, w1) + b1, 0.0)
    y = jnp.einsum("bsh,hd->bsd", h, w2) + b2
    y = y + x
    mean = jnp.mean(y, axis=-1, keepdims=True)
    var = jnp.mean((y - mean) ** 2, axis=-1, keepdims=True)
    return (y - mean) / jnp.sqrt(var + 1e-5) * gamma + beta


if __name__ == "__main__":
    batch, seq, dim_model, hidden = 2, 8, 32, 64

    key = jax.random.PRNGKey(0)
    kx, k1, k2, k3, k4 = jax.random.split(key, 5)

    x = jax.random.normal(kx, (batch, seq, dim_model), dtype=jnp.float32)

    # Deterministic parameter init (uniform, like nn.Linear defaults).
    lim1 = 1.0 / jnp.sqrt(dim_model)
    lim2 = 1.0 / jnp.sqrt(hidden)
    w1 = jax.random.uniform(k1, (dim_model, hidden), jnp.float32, -lim1, lim1)
    b1 = jax.random.uniform(k2, (hidden,), jnp.float32, -lim1, lim1)
    w2 = jax.random.uniform(k3, (hidden, dim_model), jnp.float32, -lim2, lim2)
    b2 = jax.random.uniform(k4, (dim_model,), jnp.float32, -lim2, lim2)
    gamma = jnp.ones((dim_model,), jnp.float32)   # nn.LayerNorm init
    beta = jnp.zeros((dim_model,), jnp.float32)

    out = position_wise_feed_forward(x, w1, b1, w2, b2, gamma, beta)
    out = jax.block_until_ready(out)

    ref = reference_ffn(x, w1, b1, w2, b2, gamma, beta)
    assert out.shape == x.shape and out.dtype == x.dtype
    # bf16 matmuls with f32 accumulation -> looser tolerance vs. f32 reference.
    assert jnp.allclose(out, ref, atol=2e-2, rtol=2e-2), (
        float(jnp.max(jnp.abs(out - ref))))

    print("KERNEL_OK")
</pallas_src>

<mosaic_0001>
module attributes {stable_mosaic.version = 11 : i64} {
  func.func @ffn_kernel(%arg0: i32, %arg1: i32, %arg2: memref<8x128xf32, #tpu.memory_space<vmem>>, %arg3: memref<128x128xbf16, #tpu.memory_space<vmem>>, %arg4: memref<1x128xf32, #tpu.memory_space<vmem>>, %arg5: memref<128x128xbf16, #tpu.memory_space<vmem>>, %arg6: memref<1x128xf32, #tpu.memory_space<vmem>>, %arg7: memref<1x128xf32, #tpu.memory_space<vmem>>, %arg8: memref<1x128xf32, #tpu.memory_space<vmem>>, %arg9: memref<8x128xf32, #tpu.memory_space<vmem>>, %arg10: memref<8x128xf32, #tpu.memory_space<vmem>>) attributes {dimension_semantics = [#tpu.dimension_semantics<parallel>, #tpu.dimension_semantics<arbitrary>], iteration_bounds = array<i64: 2, 1>, scalar_prefetch = 0 : i64, scratch_operands = 1 : i64, tpu.core_type = #tpu.core_type<tc>, window_params = [{transform_indices = @transform_0, window_bounds = array<i64: 8, 128>}, {pipeline_mode = #tpu.pipeline_mode<synchronous>, transform_indices = @transform_1, window_bounds = array<i64: 128, 128>}, {pipeline_mode = #tpu.pipeline_mode<synchronous>, transform_indices = @transform_2, window_bounds = array<i64: 1, 128>}, {pipeline_mode = #tpu.pipeline_mode<synchronous>, transform_indices = @transform_3, window_bounds = array<i64: 128, 128>}, {pipeline_mode = #tpu.pipeline_mode<synchronous>, transform_indices = @transform_4, window_bounds = array<i64: 1, 128>}, {pipeline_mode = #tpu.pipeline_mode<synchronous>, transform_indices = @transform_5, window_bounds = array<i64: 1, 128>}, {pipeline_mode = #tpu.pipeline_mode<synchronous>, transform_indices = @transform_6, window_bounds = array<i64: 1, 128>}, {transform_indices = @transform_7, window_bounds = array<i64: 8, 128>}]} {
    %c0_i32 = arith.constant 0 : i32
    %0 = arith.cmpi eq, %arg1, %c0_i32 : i32
    %1 = arith.extui %0 : i1 to i32
    %c0_i32_0 = arith.constant 0 : i32
    %2 = arith.cmpi ne, %1, %c0_i32_0 : i32
    scf.if %2 {
      %cst_16 = arith.constant 0.000000e+00 : f32
      %21 = vector.broadcast %cst_16 : f32 to vector<8x128xf32>
      %c0_17 = arith.constant 0 : index
      %c0_18 = arith.constant 0 : index
      %22 = vector.load %arg10[%c0_17, %c0_18] : memref<8x128xf32, #tpu.memory_space<vmem>>, vector<8x128xf32>
      tpu.vector_store %arg10[%c0_17, %c0_18], %21 {strides = array<i32>} : memref<8x128xf32, #tpu.memory_space<vmem>>, vector<8x128xf32>,
    } else {
    }
    %c0 = arith.constant 0 : index
    %c0_1 = arith.constant 0 : index
    %3 = vector.load %arg2[%c0, %c0_1] : memref<8x128xf32, #tpu.memory_space<vmem>>, vector<8x128xf32>
    %4 = arith.truncf %3 : vector<8x128xf32> to vector<8x128xbf16>
    %c0_2 = arith.constant 0 : index
    %c0_3 = arith.constant 0 : index
    %5 = vector.load %arg3[%c0_2, %c0_3] : memref<128x128xbf16, #tpu.memory_space<vmem>>, vector<128x128xbf16>
    %cst = arith.constant dense<0.000000e+00> : vector<8x128xf32>
    %6 = tpu.matmul %4, %5, %cst {dimension_numbers = #tpu.dot_dimension_numbers<[1], [0], [0], [1], [0, 0, 1, 1], [], []>} : vector<8x128xbf16>, vector<128x128xbf16>, vector<8x128xf32> -> vector<8x128xf32>
    %c0_4 = arith.constant 0 : index
    %c0_5 = arith.constant 0 : index
    %7 = vector.load %arg4[%c0_4, %c0_5] : memref<1x128xf32, #tpu.memory_space<vmem>>, vector<1x128xf32>
    %8 = vector.broadcast %7 : vector<1x128xf32> to vector<8x128xf32>
    %9 = arith.addf %6, %8 : vector<8x128xf32>
    %cst_6 = arith.constant 0.000000e+00 : f32
    %10 = vector.broadcast %cst_6 : f32 to vector<8x128xf32>
    %11 = arith.maximumf %9, %10 : vector<8x128xf32>
    %c0_7 = arith.constant 0 : index
    %c0_8 = arith.constant 0 : index
    %12 = vector.load %arg10[%c0_7, %c0_8] : memref<8x128xf32, #tpu.memory_space<vmem>>, vector<8x128xf32>
    %13 = arith.truncf %11 : vector<8x128xf32> to vector<8x128xbf16>
    %c0_9 = arith.constant 0 : index
    %c0_10 = arith.constant 0 : index
    %14 = vector.load %arg5[%c0_9, %c0_10] : memref<128x128xbf16, #tpu.memory_space<vmem>>, vector<128x128xbf16>
    %cst_11 = arith.constant dense<0.000000e+00> : vector<8x128xf32>
    %15 = tpu.matmul %13, %14, %cst_11 {dimension_numbers = #tpu.dot_dimension_numbers<[1], [0], [0], [1], [0, 0, 1, 1], [], []>} : vector<8x128xbf16>, vector<128x128xbf16>, vector<8x128xf32> -> vector<8x128xf32>
    %16 = arith.addf %12, %15 : vector<8x128xf32>
    %c0_12 = arith.constant 0 : index
    %c0_13 = arith.constant 0 : index
    %17 = vector.load %arg10[%c0_12, %c0_13] : memref<8x128xf32, #tpu.memory_space<vmem>>, vector<8x128xf32>
    tpu.vector_store %arg10[%c0_12, %c0_13], %16 {strides = array<i32>} : memref<8x128xf32, #tpu.memory_space<vmem>>, vector<8x128xf32>,
    %c0_i32_14 = arith.constant 0 : i32
    %18 = arith.cmpi eq, %arg1, %c0_i32_14 : i32
    %19 = arith.extui %18 : i1 to i32
    %c0_i32_15 = arith.constant 0 : i32
    %20 = arith.cmpi ne, %19, %c0_i32_15 : i32
    scf.if %20 {
      %c0_16 = arith.constant 0 : index
      %c0_17 = arith.constant 0 : index
      %21 = vector.load %arg2[%c0_16, %c0_17] : memref<8x128xf32, #tpu.memory_space<vmem>>, vector<8x128xf32>
      %c0_18 = arith.constant 0 : index
      %c0_19 = arith.constant 0 : index
      %22 = vector.load %arg10[%c0_18, %c0_19] : memref<8x128xf32, #tpu.memory_space<vmem>>, vector<8x128xf32>
      %c0_20 = arith.constant 0 : index
      %c0_21 = arith.constant 0 : index
      %23 = vector.load %arg6[%c0_20, %c0_21] : memref<1x128xf32, #tpu.memory_space<vmem>>, vector<1x128xf32>
      %24 = vector.broadcast %23 : vector<1x128xf32> to vector<8x128xf32>
      %25 = arith.addf %22, %24 : vector<8x128xf32>
      %26 = arith.addf %25, %21 : vector<8x128xf32>
      %cst_22 = arith.constant dense<0.000000e+00> : vector<8xf32>
      %27 = vector.multi_reduction <add>, %26, %cst_22 [1] : vector<8x128xf32> to vector<8xf32>
      %28 = vector.shape_cast %27 : vector<8xf32> to vector<8x1xf32>
      %cst_23 = arith.constant 3.125000e-02 : f32
      %29 = vector.broadcast %cst_23 : f32 to vector<8x1xf32>
      %30 = arith.mulf %28, %29 : vector<8x1xf32>
      %31 = vector.broadcast %30 : vector<8x1xf32> to vector<8x128xf32>
      %32 = arith.subf %26, %31 : vector<8x128xf32>
      %33 = tpu.iota {dimensions = array<i32: 1>} : vector<8x128xi32>
      %c32_i32 = arith.constant 32 : i32
      %34 = vector.broadcast %c32_i32 : i32 to vector<8x128xi32>
      %35 = arith.cmpi slt, %33, %34 : vector<8x128xi32>
      %cst_24 = arith.constant 0.000000e+00 : f32
      %36 = vector.broadcast %cst_24 : f32 to vector<8x128xf32>
      %37 = arith.select %35, %32, %36 : vector<8x128xi1>, vector<8x128xf32>
      %38 = arith.mulf %37, %37 : vector<8x128xf32>
      %cst_25 = arith.constant dense<0.000000e+00> : vector<8xf32>
      %39 = vector.multi_reduction <add>, %38, %cst_25 [1] : vector<8x128xf32> to vector<8xf32>
      %40 = vector.shape_cast %39 : vector<8xf32> to vector<8x1xf32>
      %cst_26 = arith.constant 3.125000e-02 : f32
      %41 = vector.broadcast %cst_26 : f32 to vector<8x1xf32>
      %42 = arith.mulf %40, %41 : vector<8x1xf32>
      %cst_27 = arith.constant 9.99999974E-6 : f32
      %43 = vector.broadcast %cst_27 : f32 to vector<8x1xf32>
      %44 = arith.addf %42, %43 : vector<8x1xf32>
      %45 = math.rsqrt %44 : vector<8x1xf32>
      %46 = vector.broadcast %45 : vector<8x1xf32> to vector<8x128xf32>
      %47 = arith.mulf %37, %46 : vector<8x128xf32>
      %c0_28 = arith.constant 0 : index
      %c0_29 = arith.constant 0 : index
      %48 = vector.load %arg7[%c0_28, %c0_29] : memref<1x128xf32, #tpu.memory_space<vmem>>, vector<1x128xf32>
      %49 = vector.broadcast %48 : vector<1x128xf32> to vector<8x128xf32>
      %50 = arith.mulf %47, %49 : vector<8x128xf32>
      %c0_30 = arith.constant 0 : index
      %c0_31 = arith.constant 0 : index
      %51 = vector.load %arg8[%c0_30, %c0_31] : memref<1x128xf32, #tpu.memory_space<vmem>>, vector<1x128xf32>
      %52 = vector.broadcast %51 : vector<1x128xf32> to vector<8x128xf32>
      %53 = arith.addf %50, %52 : vector<8x128xf32>
      %c0_32 = arith.constant 0 : index
      %c0_33 = arith.constant 0 : index
      %54 = vector.load %arg9[%c0_32, %c0_33] : memref<8x128xf32, #tpu.memory_space<vmem>>, vector<8x128xf32>
      tpu.vector_store %arg9[%c0_32, %c0_33], %53 {strides = array<i32>} : memref<8x128xf32, #tpu.memory_space<vmem>>, vector<8x128xf32>,
    } else {
    }
    return
  }
  func.func @transform_0(%arg0: i32, %arg1: i32) -> (i32, i32) {
    %c0_i32 = arith.constant 0 : i32
    %c0_i32_0 = arith.constant 0 : i32
    return %arg0, %c0_i32 : i32, i32
  }
  func.func @transform_1(%arg0: i32, %arg1: i32) -> (i32, i32) {
    %c0_i32 = arith.constant 0 : i32
    %c0_i32_0 = arith.constant 0 : i32
    %c0_i32_1 = arith.constant 0 : i32
    return %c0_i32, %c0_i32_0 : i32, i32
  }
  func.func @transform_2(%arg0: i32, %arg1: i32) -> (i32, i32) {
    %c0_i32 = arith.constant 0 : i32
    %c0_i32_0 = arith.constant 0 : i32
    %c0_i32_1 = arith.constant 0 : i32
    return %c0_i32, %c0_i32_0 : i32, i32
  }
  func.func @transform_3(%arg0: i32, %arg1: i32) -> (i32, i32) {
    %c0_i32 = arith.constant 0 : i32
    %c0_i32_0 = arith.constant 0 : i32
    %c0_i32_1 = arith.constant 0 : i32
    return %c0_i32, %c0_i32_0 : i32, i32
  }
  func.func @transform_4(%arg0: i32, %arg1: i32) -> (i32, i32) {
    %c0_i32 = arith.constant 0 : i32
    %c0_i32_0 = arith.constant 0 : i32
    %c0_i32_1 = arith.constant 0 : i32
    return %c0_i32, %c0_i32_0 : i32, i32
  }
  func.func @transform_5(%arg0: i32, %arg1: i32) -> (i32, i32) {
    %c0_i32 = arith.constant 0 : i32
    %c0_i32_0 = arith.constant 0 : i32
    %c0_i32_1 = arith.constant 0 : i32
    return %c0_i32, %c0_i32_0 : i32, i32
  }
  func.func @transform_6(%arg0: i32, %arg1: i32) -> (i32, i32) {
    %c0_i32 = arith.constant 0 : i32
    %c0_i32_0 = arith.constant 0 : i32
    %c0_i32_1 = arith.constant 0 : i32
    return %c0_i32, %c0_i32_0 : i32, i32
  }
  func.func @transform_7(%arg0: i32, %arg1: i32) -> (i32, i32) {
    %c0_i32 = arith.constant 0 : i32
    %c0_i32_0 = arith.constant 0 : i32
    return %arg0, %c0_i32 : i32, i32
  }
}

</mosaic_0001>

<bundles_post_ra>
// kernel: tpu_custom_call.1
= control target key start
LH: loop header
LB: loop body
LE: loop exit
PB: predicated region body
PF: predicated region fallthrough
CT: control target
= control target key end

     0   :  { %s1243_s0 = inlined_call_operand.hbm [shape: f32[16,128], index: 0, kind: input, shape index: {}]   ;;  %s1244_s1 = inlined_call_operand.hbm [shape: bf16[128,128], index: 1, kind: input, shape index: {}]   ;;  %s1245_s2 = inlined_call_operand.vmem [shape: f32[1,128], index: 2, kind: input, shape index: {}]   ;;  %s1246_s3 = inlined_call_operand.hbm [shape: bf16[128,128], index: 3, kind: input, shape index: {}]   ;;  %s1247_s4 = inlined_call_operand.vmem [shape: f32[1,128], index: 4, kind: input, shape index: {}]   ;;  %s1248_s5 = inlined_call_operand.vmem [shape: f32[1,128], index: 5, kind: input, shape index: {}]   ;;  %s1249_s6 = inlined_call_operand.vmem [shape: f32[1,128], index: 6, kind: input, shape index: {}]   ;;  %s1250_s7 = inlined_call_operand.hbm [shape: f32[16,128], index: 7, kind: output, shape index: {}]  }
   0x1   :  { %1251 = sst [smem:[#allocation13_spill]] %s1244_s1 }
   0x2   :  { %12 = vsyncpa [#allocation4], 0 }
   0x3   :  { %14 = vsyncpa [#allocation4 + $0x1], 0 }
   0x4   :  { %15 = vsyncpa [#allocation7], 0 }
   0x5   :  { %16 = vsyncpa [#allocation5], 0 }
   0x6   :  { %18 = vsyncpa [#allocation5 + $0x1], 0  ;;  %s1080_s24 = smov 0   ;;  %s1082_s25 = smov 0  }
   0x7   :  { %s1084_s26 = smov 0   ;;  %s1086_s27 = smov 0  }
   0x8   :  { %s1088_s28 = smov 0   ;;  %s1090_s29 = smov 0  }
   0x9 LB: > { %s670_s30 = sadd.s32 4294967295, %s1034_s29   ;;  %p672_p0 = scmp.ge.s32.totalorder %s1034_s29, 1  ;;  %s1034_s29 = sphi %s1090_s29, %s24_s29   ;;  %s1030_s28 = sphi %s1088_s28, %s1262_s28   ;;  %s1026_s27 = sphi %s1086_s27, %s1261_s27   ;;  %s1022_s26 = sphi %s1084_s26, %s1260_s26   ;;  %s1018_s25 = sphi %s1082_s25, %s1259_s25   ;;  %s1014_s24 = sphi %s1080_s24, %s1258_s24  }
   0xa   : > { %p1114_p1 = scmp.eq.s32.totalorder %s670_s30, 0  ;;  %p219_p2 = scmp.lt.s32.totalorder %s1034_s29, 3 }
   0xb   : > { %s1253_s1 = sld [smem:[#allocation13_spill]]  ;;  %s1036_s13 = smov [#allocation6]  }
   0xc   : > { %p1122_p3 = pnand %p672_p0, %p219_p2  ;;  %s232_s14 = sshll.u32 %s1036_s13, 4  ;;  %s233_s14 = int_to_ptr.vmem [resolvable:$true] %s232_s14 }
   0xd   : > { %p675_p6 = scmp.ge.s32.totalorder %s1034_s29, 2  ;;  %s247_s17 = sshll.u32 %s1246_s3, 4  ;;  %s248_s17 = int_to_ptr.hbm [resolvable:$true] %s247_s17 }
   0xe   : > { %p779_p4 = pneg %p1122_p3  ;;  %s1037_s18 = smov 64  }
   0xf   : > { %s1038_s19 = smov 4   ;;  %s1039_s20 = smov [#allocation8]  }
  0x10   : > { %p780_p5 = pnand %p779_p4, %p1114_p1  ;;  %s249_s21 = sshll.u32 %s1039_s20, 4  ;;  %s250_s21 = int_to_ptr.vmem [resolvable:$true] %s249_s21 }
  0x11   : > { %s230_s11 = sshll.u32 %s1253_s1, 4  ;;  %s36_s22 = sadd.s32 1, %s1030_s28  ;;  %s231_s11 = int_to_ptr.hbm [resolvable:$true] %s230_s11 }
  0x12   : > { %782 = dma.hbm_to_vmem [thread:$0]  (!%p780_p5), %s231_s11, 1024, %s233_s14, [#allocation7], %s1037_s18, %s1037_s18, %s1038_s19  }
  0x13   : > { %785 = dma.hbm_to_vmem [thread:$0]  (!%p780_p5), %s248_s17, 1024, %s250_s21, [#allocation7], %s1037_s18, %s1037_s18, %s1038_s19  }
  0x14   : > { %s671_s23 = sadd.s32 4294967294, %s1034_s29   ;;  %p38_p7 = scmp.ge.s32.totalorder %s36_s22, 2 }
  0x15   : > { %s43_s9 = sadd.s32 1, %s1022_s26  ;;  %p50_p8 = scmp.ne.s32.totalorder %s1022_s26, %s1018_s25 }
  0x16   : > { %s1264_s22 = smov (%p38_p7, %s36_s22), 0  ;;  %p51_p9 = scmp.eq.s32.totalorder %s1034_s29, 0 }
  0x17   : > { %p56_p10 = scmp.ne.s32.totalorder %s1018_s25, %s1014_s24  ;;  %s40_s10 = ssub.s32 %s1030_s28, %s1264_s22 }
  0x18   : > { %p206_p11 = scmp.eq.s32.totalorder %s670_s30, 1  ;;  %p41_p12 = scmp.eq.s32.totalorder %s40_s10, 0 }
  0x19   : > { %p1150_p13 = por %p1114_p1, %p56_p10  ;;  %p212_p2 = scmp.eq.s32.totalorder %s671_s23, 1 }
  0x1a   : > { %p1154_p0 = por %p206_p11, %p50_p8  ;;  %p52_p4 = por %p51_p9, %p50_p8 }
  0x1b   : > { %s1159_s14 = scalar_select %p41_p12, %s1022_s26, %s43_s9  }
  0x1c   : > { %p1161_p5 = por %p212_p2, %p56_p10  ;;  %s272_s16 = sand.u32 1, %s1022_s26  }
  0x1d   : > { %s677_s30 = sshll.u32 %s1030_s28, 3  ;;  %p796_p7 = scmp.lt.s32.totalorder %s1034_s29, 2 }
  0x1e   : > { %s676_s17 = sshll.u32 %s272_s16, 3  ;;  %s280_s20 = scalar_lea.hbm %s1243_s0, %s677_s30 }
  0x1f   : > { %s282_s21 = sshll.u32 %s280_s20, 4  ;;  %s276_s10 = scalar_lea.vmem [#allocation3], %s676_s17  ;;  %s283_s21 = int_to_ptr.hbm [resolvable:$true] %s282_s21 }
  0x20   : > { %s284_s1 = sshll.u32 %s276_s10, 4  ;;  %p787_p11 = pnand %p796_p7, %p52_p4  ;;  %s285_s1 = int_to_ptr.vmem [resolvable:$true] %s284_s1 }
  0x21   : > { %s273_s23 = scalar_lea.sflag [#allocation4], %s272_s16  ;;  %293 = sbr.rel (%p1122_p3) target bundleno = 605 (0x25d), region = 48 }
  0x22   : > { %789 = dma.hbm_to_vmem [thread:$0]  (!%p787_p11), %s283_s21, 128, %s285_s1, %s273_s23  }
  0x23   : > { %s1174_s9 = sand.u32 (!%p1122_p3), 1, %s1018_s25  }
  0x24   : > { %s679_s18 = sshll.u32 (!%p1122_p3), %s1174_s9, 3  ;;  %s296_s30 = scalar_lea.sflag (!%p1122_p3), [#allocation4], %s1174_s9 }
  0x25   : > { %s1180_s17 = scalar_lea.vmem (!%p1122_p3), [#allocation3], %s679_s18 }
  0x26   : > { %1001 = dma.done.wait (%p1150_p13), %s296_s30, 128  }
  0x27   : > { %1003 = vsyncadd (%p1150_p13), %s296_s30, 4294967168 }
  0x28   : > { %1005 = dma.done.wait (%p1114_p1), [#allocation7], 2048  }
  0x29   : > { %1007 = vsyncadd (%p1114_p1), [#allocation7], 4294965248  ;;  %v758_v0 = vld [vmem:[#allocation6 + $0x38] sm:$0xff]  ;;  %v757_v1 = vld [vmem:[#allocation6 + $0x30] sm:$0xff]  ;;  %v526_v29 = vlaneseq  ;;  %s748_s16 = sshll.u32 %s1026_s27, 3  ;;  %s340_s27 = scalar_lea.vmem [#allocation9], %s679_s18 }
  0x2a   : > { %416 = vmatpush.bf16.msra.mxu0 %v758_v0  ;;  %v766_v2 = vld [vmem:[#allocation8 + $0x38] sm:$0xff]  ;;  %v765_v3 = vld [vmem:[#allocation8 + $0x30] sm:$0xff]  ;;  %v756_v4 = vld [vmem:[#allocation6 + $0x28] sm:$0xff]  ;;  %s568_s23 = scalar_lea.hbm %s1250_s7, %s748_s16  ;;  %s570_s1 = sshll.u32 %s340_s27, 4  ;;  %s571_s1 = int_to_ptr.vmem [resolvable:$true] %s570_s1 }
  0x2b   : > { %496 = vmatpush.bf16.msra.mxu1 %v766_v2  ;;  %v764_v5 = vld [vmem:[#allocation8 + $0x28] sm:$0xff]  ;;  %v755_v6 = vld [vmem:[#allocation6 + $0x20] sm:$0xff]  ;;  %v754_v8 = vld [vmem:[#allocation6 + $0x18] sm:$0xff]  ;;  %v527_v30 = vand.u32 127, %v526_v29  ;;  %s572_s8 = sshll.u32 %s568_s23, 4  ;;  %s558_s12 = scalar_lea.sflag [#allocation5], %s1174_s9  ;;  %s573_s8 = int_to_ptr.hbm [resolvable:$true] %s572_s8 }
  0x2c   : > { %v763_v7 = vld [vmem:[#allocation8 + $0x20] sm:$0xff]  ;;  %v762_v9 = vld [vmem:[#allocation8 + $0x18] sm:$0xff]  ;;  %v753_v10 = vld [vmem:[#allocation6 + $0x10] sm:$0xff]  ;;  %s962_s11 = sshra.s32 %s573_s8, 4  ;;  %s968_s21 = scalar_lea.hbm %s1250_s7, 16  ;;  %s963_s11 = int_to_ptr.hbm [resolvable:$true] %s962_s11 }
  0x2d   : > { %v761_v11 = vld [vmem:[#allocation8 + $0x10] sm:$0xff]  ;;  %v752_v12 = vld [vmem:[#allocation6 + $0x8] sm:$0xff]  ;;  %v751_v13 = vld [vmem:[#allocation6] sm:$0xff]  ;;  %vm528_vm0 = vcmp.lt.s32.totalorder %v527_v30, 32  ;;  %s964_s16 = scalar_lea.hbm %s963_s11, 8  ;;  %p969_p9 = scmp.lt.s32.totalorder %s963_s11, %s1250_s7 }
  0x2e   : > { %417 = vmatpush.bf16.msra.mxu0 %v757_v1  ;;  %v346_v14 = vld [vmem:[%s1180_s17] sm:$0xff]  ;;  %v760_v16 = vld [vmem:[#allocation8 + $0x8] sm:$0xff]  ;;  %v759_v17 = vld [vmem:[#allocation8] sm:$0xff]  ;;  %p965_p1 = scmp.ne.s32.totalorder %s963_s11, %s964_s16  ;;  %p970_p10 = scmp.lt.s32.totalorder %s968_s21, %s964_s16 }
  0x2f   : > { %497 = vmatpush.bf16.msra.mxu1 %v765_v3  ;;  %v347_v15 = vpack.c.bf16 %v346_v14, %v346_v14  ;;  %v852_v18 = vld [vmem:[%s1245_s2] ss:$0 sm:$0xff] }
  0x30   : > { %v853_v24 = vld [vmem:[%s1247_s4] ss:$0 sm:$0xff]  ;;  %p966_p3 = pnand %p965_p1, %p1154_p0  ;;  %p971_p12 = por %p970_p10, %p969_p9 }
  0x31   : > { %v854_v45 = vld [vmem:[%s1248_s5] ss:$0 sm:$0xff] }
  0x32   : > { %418 = vmatpush.bf16.msra.mxu0 %v756_v4  ;;  %v855_v48 = vld [vmem:[%s1249_s6] ss:$0 sm:$0xff]  ;;  %p967_p8 = pneg %p966_p3 }
  0x33   : > { %498 = vmatpush.bf16.msra.mxu1 %v764_v5 }
  0x34   : > { %p972_p13 = pnand %p971_p12, %p967_p8 }
  0x36   : > { %419 = vmatpush.bf16.msra.mxu0 %v755_v6 }
  0x37   : > { %499 = vmatpush.bf16.msra.mxu1 %v763_v7 }
  0x3a   : > { %420 = vmatpush.bf16.msra.mxu0 %v754_v8 }
  0x3b   : > { %500 = vmatpush.bf16.msra.mxu1 %v762_v9 }
  0x3e   : > { %421 = vmatpush.bf16.msra.mxu0 %v753_v10 }
  0x3f   : > { %501 = vmatpush.bf16.msra.mxu1 %v761_v11 }
  0x42   : > { %422 = vmatpush.bf16.msra.mxu0 %v752_v12 }
  0x43   : > { %502 = vmatpush.bf16.msra.mxu1 %v760_v16 }
  0x46   : > { %423 = vmatpush.bf16.msra.mxu0 %v751_v13 }
  0x47   : > { %503 = vmatpush.bf16.msra.mxu1 %v759_v17 }
  0x49   : > { %424 = vmatmul.bf16.vlgmr.msra.gmra.mxu0 %v347_v15 }
  0xc6   : > { %v425_v19 = vpop.f32.mrf.mxu0 }
  0xc7   : > { %v426_v20 = vadd.f32 %v852_v18, %v425_v19 }
  0xc9   : > { %v429_v21 = vmax.f32 %v426_v20, 0.0 }
  0xcb   : > { %v431_v22 = vpack.c.bf16 %v429_v21, %v429_v21 }
  0xcd   : > { %504 = vmatmul.bf16.vlgmr.msra.gmra.mxu1 %v431_v22 }
  0xce   : > { %v427_v23 = vpop.f32.mrf.mxu0 }
 0x14a   : > { %v505_v25 = vpop.f32.mrf.mxu1 }
 0x14b   : > { %v520_v26 = vadd.f32 %v853_v24, %v505_v25 }
 0x14d   : > { %v521_v27 = vadd.f32 %v520_v26, %v346_v14 }
 0x14f   : > { %522 = vadd.xlane.f32.xlu0 %v521_v27 }
 0x152   : > { %v507_v28 = vpop.f32.mrf.mxu1 }
 0x1c2   : > { %v523_v31 = vpop.xlane.xlu0 %522 }
 0x1c3   : > { %v524_v32 = vmul.f32 0.03125, %v523_v31 }
 0x1c5   : > { %v525_v33 = vsub.f32 %v521_v27, %v524_v32 }
 0x1c7   : > { %v529_v34 = vsel %vm528_vm0, %v525_v33, 0.0 }
 0x1c8   : > { %v530_v35 = vmul.f32 %v529_v34, %v529_v34 }
 0x1ca   : > { %531 = vadd.xlane.f32.xlu0 %v530_v35 }
 0x23d   : > { %v532_v36 = vpop.xlane.xlu0 %531 }
 0x23e   : > { %v533_v37 = vmul.f32 0.03125, %v532_v36 }
 0x240   : > { %v534_v38 = vadd.f32 1e-05, %v533_v37 }
 0x242   : > { %856 = vrsqrt.f32 %v534_v38  ;;  %vm541_vm2 = vweird.f32 %v534_v38 }
 0x248   : > { %v857_v39 = vpop.eup %856 }
 0x249   : > { %v536_v40 = vmul.f32 %v857_v39, %v534_v38  ;;  %vm542_vm1 = vweird.f32 %v857_v39 }
 0x24a   : > { %vm543_vm3 = vmor %vm541_vm2, %vm542_vm1 }
 0x24b   : > { %v537_v41 = vmul.f32 %v857_v39, %v536_v40 }
 0x24d   : > { %v538_v42 = vmul.f32 0.5, %v537_v41 }
 0x24f   : > { %v539_v43 = vsub.f32 1.5, %v538_v42 }
 0x251   : > { %v540_v44 = vmul.f32 %v857_v39, %v539_v43 }
 0x253   : > { %v544_v46 = vsel %vm543_vm3, %v857_v39, %v540_v44 }
 0x254   : > { %v545_v47 = vmul.f32 %v544_v46, %v529_v34 }
 0x256   : > { %v550_v49 = vmul.f32 %v854_v45, %v545_v47 }
 0x258   : > { %v555_v50 = vadd.f32 %v855_v48, %v550_v49 }
 0x25a   : > { %556 = vst [vmem:[%s340_s27] sm:$0xff] %v555_v50 }
 0x25b   : > { %975 = shalt.err (!%p972_p13)
}
 0x25c   : > { %777 = dma.vmem_to_hbm [thread:$0]  (%p1154_p0), %s571_s1, 128, %s573_s8, %s558_s12  }
 0x25d PF: > { %s584_s9 = sand.u32 1, %s1014_s24   ;;  %p791_p2 = pnand %p675_p6, %p1161_p5 }
 0x25e   : > { %s585_s23 = scalar_lea.sflag [#allocation5], %s584_s9 }
 0x25f   : > { %p792_p4 = pneg %p791_p2 }
 0x261   : > { %1009 = dma.done.wait (%p792_p4), %s585_s23, 128  }
 0x262   : > { %1011 = vsyncadd (%p792_p4), %s585_s23, 4294967168  ;;  %s24_s29 = sadd.s32 1, %s1034_s29   ;;  %s1258_s24 = smov %s1018_s25 }
 0x263   : > { %p21_p7 = scmp.ge.s32.totalorder %s24_s29, 4   ;;  %s1259_s25 = smov %s1022_s26 }
 0x264   : > { %s1260_s26 = smov %s1159_s14  ;;  %s1261_s27 = smov %s1030_s28 }
 0x265   : > { %s1262_s28 = smov %s1264_s22  ;;  %23 = sbr.rel (!%p21_p7) target bundleno = 9 (0x9), region = 109 }
 0x26a   :  { %591 = vsyncpa [#allocation4], 1 }
 0x26b   :  { %593 = vsyncpa [#allocation4 + $0x1], 1 }
 0x26c   :  { %594 = vsyncpa [#allocation7], 1 }
 0x26d   :  { %595 = vsyncpa [#allocation5], 1 }
 0x26e   :  { %597 = vsyncpa [#allocation5 + $0x1], 1 }

</bundles_post_ra>
